<compile_context>
chip_gen: v7x
topology: tpu7x:2x2x1
jax: 0.10.0
libtpu: 0.0.40
codegen_flags: <defaults>
</compile_context>

<pallas_src>
import jax
import jax.numpy as jnp
from jax.experimental import pallas as pl
from jax.experimental.pallas import tpu as pltpu


def bbox_kernel(x_ref, w1_ref, shifts_ref, w2_ref, pool_ref, wfc_ref, bfc_ref,
                o_ref):
    # x_ref:      (N*HW, C)  channels-last, spatially+batch flattened input
    # w1_ref/w2_ref: (C, C)  1x1-conv weights with BN scale folded in
    # shifts_ref: (2, C)     folded (conv bias + BN) shift for layer 1 / 2
    # pool_ref:   (N, N*HW)  per-batch average-pooling matrix (1/HW folded in)
    # wfc_ref:    (C, 4), bfc_ref: (1, 4)
    x = x_ref[...]
    shifts = shifts_ref[...]

    # conv1 (1x1) + folded BN + ReLU
    h1 = jnp.dot(x, w1_ref[...], preferred_element_type=jnp.float32)
    h1 = jnp.maximum(h1 + shifts[0:1, :], 0.0)

    # conv2 (1x1) + folded BN + ReLU
    h2 = jnp.dot(h1, w2_ref[...], preferred_element_type=jnp.float32)
    h2 = jnp.maximum(h2 + shifts[1:2, :], 0.0)

    # AdaptiveAvgPool2d((1,1)) per batch element, as an MXU matmul -> (N, C)
    pooled = jnp.dot(pool_ref[...], h2, preferred_element_type=jnp.float32)

    # fc: (N, C) @ (C, 4) + (1, 4)   -- no ReLU
    o_ref[...] = (jnp.dot(pooled, wfc_ref[...],
                          preferred_element_type=jnp.float32) + bfc_ref[...])


def bbox_predictor_anchor(x_nchw, params):
    """x_nchw: (N, C, H, W) float32. Returns (N, 4) float32."""
    N, C, H, W = x_nchw.shape
    HW = H * W
    # NCHW -> (N*HW, C)  (glue, plain JAX)
    x2d = jnp.transpose(x_nchw, (0, 2, 3, 1)).reshape(N * HW, C)
    w1, shifts, w2, wfc, bfc = params

    # Per-batch average pooling expressed as a matmul:
    # pool[i, j] = 1/HW if row j belongs to batch element i, else 0.
    batch_of_row = jnp.repeat(jnp.arange(N), HW)                    # (N*HW,)
    pool = (jnp.arange(N)[:, None] == batch_of_row[None, :])
    pool = pool.astype(jnp.float32) / float(HW)                     # (N, N*HW)

    return pl.pallas_call(
        bbox_kernel,
        out_shape=jax.ShapeDtypeStruct((N, 4), jnp.float32),
        grid_spec=pltpu.PrefetchScalarGridSpec(
            num_scalar_prefetch=0,
            grid=(1,),  # single invocation: whole problem fits in VMEM easily
            in_specs=[
                pl.BlockSpec((N * HW, C), lambda i: (0, 0)),   # x
                pl.BlockSpec((C, C),      lambda i: (0, 0)),   # w1 (cin, cout)
                pl.BlockSpec((2, C),      lambda i: (0, 0)),   # shifts
                pl.BlockSpec((C, C),      lambda i: (0, 0)),   # w2 (cin, cout)
                pl.BlockSpec((N, N * HW), lambda i: (0, 0)),   # pooling matrix
                pl.BlockSpec((C, 4),      lambda i: (0, 0)),   # wfc (cin, 4)
                pl.BlockSpec((1, 4),      lambda i: (0, 0)),   # bfc
            ],
            out_specs=pl.BlockSpec((N, 4), lambda i: (0, 0)),
        ),
        compiler_params=pltpu.CompilerParams(
            dimension_semantics=("arbitrary",)),
    )(x2d, w1, shifts, w2, pool, wfc, bfc)


def _fold_conv_bn(conv_w, conv_b, gamma, beta, mean, var, eps=1e-5):
    """Fold 1x1-conv bias + eval-mode BatchNorm into (W_folded, shift).

    y = BN(x @ W^T + b) = x @ (W^T * scale) + ((b - mean) * scale + beta)
    """
    scale = gamma / jnp.sqrt(var + eps)                    # (C,)
    w_folded = conv_w.T * scale[None, :]                   # (cin, cout)
    shift = (conv_b - mean) * scale + beta                 # (cout,)
    return w_folded, shift


def init_raw_params(key, inplanes):
    ks = jax.random.split(key, 14)
    C = inplanes
    p = {}
    # conv1 (1x1, bias) + BN1 (running stats)
    p["conv1_w"] = 0.05 * jax.random.normal(ks[0], (C, C), jnp.float32)
    p["conv1_b"] = 0.05 * jax.random.normal(ks[1], (C,), jnp.float32)
    p["bn1_gamma"] = 1.0 + 0.1 * jax.random.normal(ks[2], (C,), jnp.float32)
    p["bn1_beta"] = 0.1 * jax.random.normal(ks[3], (C,), jnp.float32)
    p["bn1_mean"] = 0.1 * jax.random.normal(ks[4], (C,), jnp.float32)
    p["bn1_var"] = jnp.abs(1.0 + 0.1 * jax.random.normal(ks[5], (C,), jnp.float32))
    # conv2 (1x1, bias) + BN2 (running stats)
    p["conv2_w"] = 0.05 * jax.random.normal(ks[6], (C, C), jnp.float32)
    p["conv2_b"] = 0.05 * jax.random.normal(ks[7], (C,), jnp.float32)
    p["bn2_gamma"] = 1.0 + 0.1 * jax.random.normal(ks[8], (C,), jnp.float32)
    p["bn2_beta"] = 0.1 * jax.random.normal(ks[9], (C,), jnp.float32)
    p["bn2_mean"] = 0.1 * jax.random.normal(ks[10], (C,), jnp.float32)
    p["bn2_var"] = jnp.abs(1.0 + 0.1 * jax.random.normal(ks[11], (C,), jnp.float32))
    # fc: Linear(C, 4)
    p["fc_w"] = 0.05 * jax.random.normal(ks[12], (4, C), jnp.float32)
    p["fc_b"] = 0.05 * jax.random.normal(ks[13], (4,), jnp.float32)
    return p


def fold_params(raw):
    """Fold BN into conv weights and pack kernel parameters."""
    w1, t1 = _fold_conv_bn(raw["conv1_w"], raw["conv1_b"], raw["bn1_gamma"],
                           raw["bn1_beta"], raw["bn1_mean"], raw["bn1_var"])
    w2, t2 = _fold_conv_bn(raw["conv2_w"], raw["conv2_b"], raw["bn2_gamma"],
                           raw["bn2_beta"], raw["bn2_mean"], raw["bn2_var"])
    shifts = jnp.stack([t1, t2], axis=0)          # (2, C)
    wfc = raw["fc_w"].T                           # (C, 4)
    bfc = raw["fc_b"][None, :]                    # (1, 4)
    return w1, shifts, w2, wfc, bfc


def reference(x_nchw, raw, eps=1e-5):
    """Pure-JAX reference of the original (unfolded) eval-mode forward pass."""
    N, C, H, W = x_nchw.shape
    x = jnp.transpose(x_nchw, (0, 2, 3, 1)).reshape(N, H * W, C)

    def cbr(h, w, b, g, be, m, v):
        y = h @ w.T + b
        y = (y - m) / jnp.sqrt(v + eps) * g + be
        return jnp.maximum(y, 0.0)

    h1 = cbr(x, raw["conv1_w"], raw["conv1_b"], raw["bn1_gamma"],
             raw["bn1_beta"], raw["bn1_mean"], raw["bn1_var"])
    h2 = cbr(h1, raw["conv2_w"], raw["conv2_b"], raw["bn2_gamma"],
             raw["bn2_beta"], raw["bn2_mean"], raw["bn2_var"])
    pooled = jnp.mean(h2, axis=1)                 # (N, C)
    return pooled @ raw["fc_w"].T + raw["fc_b"]   # (N, 4)


if __name__ == "__main__":
    key = jax.random.PRNGKey(0)
    k_x, k_p = jax.random.split(key)

    N, inplanes, H, W = 2, 64, 8, 8   # inplanes matches the module default
    x = jax.random.normal(k_x, (N, inplanes, H, W), jnp.float32)
    raw = init_raw_params(k_p, inplanes)
    params = fold_params(raw)

    out = bbox_predictor_anchor(x, params)
    out = jax.block_until_ready(out)

    ref = reference(x, raw)
    assert out.shape == (N, 4)
    assert jnp.allclose(out, ref, atol=1e-4, rtol=1e-4)

    # TODO(synk): BatchNorm is implemented in eval mode (running stats) and
    # folded into the conv weights; PyTorch training-mode batch statistics are
    # not reproduced here.
    print("KERNEL_OK")
</pallas_src>

<mosaic_0001>
module attributes {stable_mosaic.version = 11 : i64} {
  func.func @bbox_kernel(%arg0: i32, %arg1: memref<128x64xf32, #tpu.memory_space<vmem>>, %arg2: memref<64x64xf32, #tpu.memory_space<vmem>>, %arg3: memref<2x64xf32, #tpu.memory_space<vmem>>, %arg4: memref<64x64xf32, #tpu.memory_space<vmem>>, %arg5: memref<2x128xf32, #tpu.memory_space<vmem>>, %arg6: memref<64x4xf32, #tpu.memory_space<vmem>>, %arg7: memref<1x4xf32, #tpu.memory_space<vmem>>, %arg8: memref<2x4xf32, #tpu.memory_space<vmem>>) attributes {dimension_semantics = [#tpu.dimension_semantics<arbitrary>], iteration_bounds = array<i64: 1>, scalar_prefetch = 0 : i64, scratch_operands = 0 : i64, tpu.core_type = #tpu.core_type<tc>, window_params = [{pipeline_mode = #tpu.pipeline_mode<synchronous>, transform_indices = @transform_0, window_bounds = array<i64: 128, 64>}, {pipeline_mode = #tpu.pipeline_mode<synchronous>, transform_indices = @transform_1, window_bounds = array<i64: 64, 64>}, {pipeline_mode = #tpu.pipeline_mode<synchronous>, transform_indices = @transform_2, window_bounds = array<i64: 2, 64>}, {pipeline_mode = #tpu.pipeline_mode<synchronous>, transform_indices = @transform_3, window_bounds = array<i64: 64, 64>}, {pipeline_mode = #tpu.pipeline_mode<synchronous>, transform_indices = @transform_4, window_bounds = array<i64: 2, 128>}, {pipeline_mode = #tpu.pipeline_mode<synchronous>, transform_indices = @transform_5, window_bounds = array<i64: 64, 4>}, {pipeline_mode = #tpu.pipeline_mode<synchronous>, transform_indices = @transform_6, window_bounds = array<i64: 1, 4>}, {pipeline_mode = #tpu.pipeline_mode<synchronous>, transform_indices = @transform_7, window_bounds = array<i64: 2, 4>}]} {
    %c0 = arith.constant 0 : index
    %c0_0 = arith.constant 0 : index
    %0 = vector.load %arg1[%c0, %c0_0] : memref<128x64xf32, #tpu.memory_space<vmem>>, vector<128x64xf32>
    %c0_1 = arith.constant 0 : index
    %c0_2 = arith.constant 0 : index
    %1 = vector.load %arg3[%c0_1, %c0_2] : memref<2x64xf32, #tpu.memory_space<vmem>>, vector<2x64xf32>
    %c0_3 = arith.constant 0 : index
    %c0_4 = arith.constant 0 : index
    %2 = vector.load %arg2[%c0_3, %c0_4] : memref<64x64xf32, #tpu.memory_space<vmem>>, vector<64x64xf32>
    %cst = arith.constant dense<0.000000e+00> : vector<128x64xf32>
    %3 = tpu.matmul %0, %2, %cst {dimension_numbers = #tpu.dot_dimension_numbers<[1], [0], [0], [1], [0, 0, 1, 1], [], []>} : vector<128x64xf32>, vector<64x64xf32>, vector<128x64xf32> -> vector<128x64xf32>
    %4 = vector.extract_strided_slice %1 {offsets = [0, 0], sizes = [1, 64], strides = [1, 1]} : vector<2x64xf32> to vector<1x64xf32>
    %5 = vector.broadcast %4 : vector<1x64xf32> to vector<128x64xf32>
    %6 = arith.addf %3, %5 : vector<128x64xf32>
    %cst_5 = arith.constant 0.000000e+00 : f32
    %7 = vector.broadcast %cst_5 : f32 to vector<128x64xf32>
    %8 = arith.maximumf %6, %7 : vector<128x64xf32>
    %c0_6 = arith.constant 0 : index
    %c0_7 = arith.constant 0 : index
    %9 = vector.load %arg4[%c0_6, %c0_7] : memref<64x64xf32, #tpu.memory_space<vmem>>, vector<64x64xf32>
    %cst_8 = arith.constant dense<0.000000e+00> : vector<128x64xf32>
    %10 = tpu.matmul %8, %9, %cst_8 {dimension_numbers = #tpu.dot_dimension_numbers<[1], [0], [0], [1], [0, 0, 1, 1], [], []>} : vector<128x64xf32>, vector<64x64xf32>, vector<128x64xf32> -> vector<128x64xf32>
    %11 = vector.extract_strided_slice %1 {offsets = [1, 0], sizes = [1, 64], strides = [1, 1]} : vector<2x64xf32> to vector<1x64xf32>
    %12 = vector.broadcast %11 : vector<1x64xf32> to vector<128x64xf32>
    %13 = arith.addf %10, %12 : vector<128x64xf32>
    %cst_9 = arith.constant 0.000000e+00 : f32
    %14 = vector.broadcast %cst_9 : f32 to vector<128x64xf32>
    %15 = arith.maximumf %13, %14 : vector<128x64xf32>
    %c0_10 = arith.constant 0 : index
    %c0_11 = arith.constant 0 : index
    %16 = vector.load %arg5[%c0_10, %c0_11] : memref<2x128xf32, #tpu.memory_space<vmem>>, vector<2x128xf32>
    %cst_12 = arith.constant dense<0.000000e+00> : vector<2x64xf32>
    %17 = tpu.matmul %16, %15, %cst_12 {dimension_numbers = #tpu.dot_dimension_numbers<[1], [0], [0], [1], [0, 0, 1, 1], [], []>} : vector<2x128xf32>, vector<128x64xf32>, vector<2x64xf32> -> vector<2x64xf32>
    %c0_13 = arith.constant 0 : index
    %c0_14 = arith.constant 0 : index
    %18 = vector.load %arg6[%c0_13, %c0_14] : memref<64x4xf32, #tpu.memory_space<vmem>>, vector<64x4xf32>
    %cst_15 = arith.constant dense<0.000000e+00> : vector<2x4xf32>
    %19 = tpu.matmul %17, %18, %cst_15 {dimension_numbers = #tpu.dot_dimension_numbers<[1], [0], [0], [1], [0, 0, 1, 1], [], []>} : vector<2x64xf32>, vector<64x4xf32>, vector<2x4xf32> -> vector<2x4xf32>
    %c0_16 = arith.constant 0 : index
    %c0_17 = arith.constant 0 : index
    %20 = vector.load %arg7[%c0_16, %c0_17] : memref<1x4xf32, #tpu.memory_space<vmem>>, vector<1x4xf32>
    %21 = vector.broadcast %20 : vector<1x4xf32> to vector<2x4xf32>
    %22 = arith.addf %19, %21 : vector<2x4xf32>
    %c0_18 = arith.constant 0 : index
    %c0_19 = arith.constant 0 : index
    %23 = vector.load %arg8[%c0_18, %c0_19] : memref<2x4xf32, #tpu.memory_space<vmem>>, vector<2x4xf32>
    tpu.vector_store %arg8[%c0_18, %c0_19], %22 {strides = array<i32>} : memref<2x4xf32, #tpu.memory_space<vmem>>, vector<2x4xf32>,
    return
  }
  func.func @transform_0(%arg0: i32) -> (i32, i32) {
    %c0_i32 = arith.constant 0 : i32
    %c0_i32_0 = arith.constant 0 : i32
    %c0_i32_1 = arith.constant 0 : i32
    return %c0_i32, %c0_i32_0 : i32, i32
  }
  func.func @transform_1(%arg0: i32) -> (i32, i32) {
    %c0_i32 = arith.constant 0 : i32
    %c0_i32_0 = arith.constant 0 : i32
    %c0_i32_1 = arith.constant 0 : i32
    return %c0_i32, %c0_i32_0 : i32, i32
  }
  func.func @transform_2(%arg0: i32) -> (i32, i32) {
    %c0_i32 = arith.constant 0 : i32
    %c0_i32_0 = arith.constant 0 : i32
    %c0_i32_1 = arith.constant 0 : i32
    return %c0_i32, %c0_i32_0 : i32, i32
  }
  func.func @transform_3(%arg0: i32) -> (i32, i32) {
    %c0_i32 = arith.constant 0 : i32
    %c0_i32_0 = arith.constant 0 : i32
    %c0_i32_1 = arith.constant 0 : i32
    return %c0_i32, %c0_i32_0 : i32, i32
  }
  func.func @transform_4(%arg0: i32) -> (i32, i32) {
    %c0_i32 = arith.constant 0 : i32
    %c0_i32_0 = arith.constant 0 : i32
    %c0_i32_1 = arith.constant 0 : i32
    return %c0_i32, %c0_i32_0 : i32, i32
  }
  func.func @transform_5(%arg0: i32) -> (i32, i32) {
    %c0_i32 = arith.constant 0 : i32
    %c0_i32_0 = arith.constant 0 : i32
    %c0_i32_1 = arith.constant 0 : i32
    return %c0_i32, %c0_i32_0 : i32, i32
  }
  func.func @transform_6(%arg0: i32) -> (i32, i32) {
    %c0_i32 = arith.constant 0 : i32
    %c0_i32_0 = arith.constant 0 : i32
    %c0_i32_1 = arith.constant 0 : i32
    return %c0_i32, %c0_i32_0 : i32, i32
  }
  func.func @transform_7(%arg0: i32) -> (i32, i32) {
    %c0_i32 = arith.constant 0 : i32
    %c0_i32_0 = arith.constant 0 : i32
    %c0_i32_1 = arith.constant 0 : i32
    return %c0_i32, %c0_i32_0 : i32, i32
  }
}

</mosaic_0001>

<bundles_post_ra>
// kernel: tpu_custom_call.1
= control target key start
LH: loop header
LB: loop body
LE: loop exit
PB: predicated region body
PF: predicated region fallthrough
CT: control target
= control target key end

     0   :  { %vm56_vm0 = vcmask 523264   ;;  %s1256_s0 = inlined_call_operand.vmem [shape: f32[128,64], index: 0, kind: input, shape index: {}]   ;;  %s1257_s1 = inlined_call_operand.vmem [shape: f32[64,64], index: 1, kind: input, shape index: {}]   ;;  %s1258_s2 = inlined_call_operand.vmem [shape: f32[2,64], index: 2, kind: input, shape index: {}]   ;;  %s1259_s3 = inlined_call_operand.vmem [shape: f32[64,64], index: 3, kind: input, shape index: {}]   ;;  %s1260_s4 = inlined_call_operand.vmem [shape: f32[2,128], index: 4, kind: input, shape index: {}]   ;;  %s1261_s5 = inlined_call_operand.vmem [shape: f32[64,4], index: 5, kind: input, shape index: {}]   ;;  %s1262_s6 = inlined_call_operand.vmem [shape: f32[1,4], index: 6, kind: input, shape index: {}]   ;;  %s1263_s7 = inlined_call_operand.hbm [shape: f32[2,4], index: 7, kind: output, shape index: {}]  }
   0x1   :  { %v44_v0 = vld [vmem:[%s1257_s1] sm:$0xff]  ;;  %v45_v1 = vld [vmem:[%s1257_s1 + $0x8] sm:$0xff]  ;;  %v46_v2 = vld [vmem:[%s1257_s1 + $0x10] sm:$0xff] }
   0x2   :  { %v904_v3 = vpack.c.bf16 %v45_v1, %v44_v0  ;;  %v47_v4 = vld [vmem:[%s1257_s1 + $0x18] sm:$0xff]  ;;  %v48_v6 = vld [vmem:[%s1257_s1 + $0x20] sm:$0xff]  ;;  %v49_v7 = vld [vmem:[%s1257_s1 + $0x28] sm:$0xff] }
   0x3   :  { %v908_v5 = vpack.c.bf16 %v47_v4, %v46_v2  ;;  %v27_v8 = vld [vmem:[%s1256_s0] sm:$0xff]  ;;  %v912_v9 = vpack.c.bf16 %v49_v7, %v48_v6  ;;  %v50_v10 = vld [vmem:[%s1257_s1 + $0x30] sm:$0xff]  ;;  %v51_v11 = vld [vmem:[%s1257_s1 + $0x38] sm:$0xff] }
   0x4   :  { %905 = vmatprep.subr.bf16.mxu0 %v904_v3  ;;  %786 = vmatprep.mubr.msk.f32.mxu0 %vm56_vm0, %v27_v8  ;;  %v266_v12 = vld [vmem:[%s1259_s3] sm:$0xff]  ;;  %v267_v13 = vld [vmem:[%s1259_s3 + $0x8] sm:$0xff]  ;;  %v268_v14 = vld [vmem:[%s1259_s3 + $0x10] sm:$0xff]  ;;  %v916_v15 = vpack.c.bf16 %v51_v11, %v50_v10 }
   0x5   :  { %907 = vmatpush3.bf16.msra.mxu0 %v904_v3  ;;  %v920_v16 = vpack.c.bf16 %v267_v13, %v266_v12  ;;  %v269_v17 = vld [vmem:[%s1259_s3 + $0x18] sm:$0xff]  ;;  %v270_v19 = vld [vmem:[%s1259_s3 + $0x20] sm:$0xff]  ;;  %v271_v20 = vld [vmem:[%s1259_s3 + $0x28] sm:$0xff] }
   0x6   :  { %909 = vmatprep.subr.bf16.mxu0 %v908_v5  ;;  %v924_v18 = vpack.c.bf16 %v269_v17, %v268_v14 }
   0x9   :  { %911 = vmatpush3.bf16.msra.mxu0 %v908_v5 }
   0xa   :  { %913 = vmatprep.subr.bf16.mxu0 %v912_v9 }
   0xb   :  { %12 = vsyncpa [#allocation3], 0  ;;  %921 = vmatprep.subr.bf16.mxu1 %v920_v16  ;;  %v928_v21 = vpack.c.bf16 %v271_v20, %v270_v19  ;;  %v28_v22 = vld [vmem:[%s1256_s0 + $0x8] sm:$0xff]  ;;  %v29_v23 = vld [vmem:[%s1256_s0 + $0x10] sm:$0xff]  ;;  %v52_v40 = vlaneseq  ;;  %vm1001_vm1 = vmmov 0   ;;  %s1003_s11 = smov [#allocation2]  }
   0xc   :  { %923 = vmatpush3.bf16.msra.mxu1 %v920_v16  ;;  %v30_v24 = vld [vmem:[%s1256_s0 + $0x18] sm:$0xff]  ;;  %v31_v25 = vld [vmem:[%s1256_s0 + $0x20] sm:$0xff]  ;;  %v32_v26 = vld [vmem:[%s1256_s0 + $0x28] sm:$0xff]  ;;  %s654_s12 = sshll.u32 %s1003_s11, 4  ;;  %vm646_vm2 = vcmask 25600   ;;  %s655_s12 = int_to_ptr.vmem [resolvable:$true] %s654_s12 }
   0xd   :  { %915 = vmatpush3.bf16.msra.mxu0 %v912_v9  ;;  %925 = vmatprep.subr.bf16.mxu1 %v924_v18  ;;  %v33_v27 = vld [vmem:[%s1256_s0 + $0x30] sm:$0xff]  ;;  %v34_v28 = vld [vmem:[%s1256_s0 + $0x38] sm:$0xff]  ;;  %v35_v29 = vld [vmem:[%s1256_s0 + $0x40] sm:$0xff]  ;;  %v1156_v41 = vshrl.u32 %v52_v40, 7  ;;  %s976_s13 = scalar_lea.vmem %s655_s12, 32  ;;  %p981_p1 = scmp.lt.s32.totalorder %s655_s12, %s655_s12 }
   0xe   :  { %917 = vmatprep.subr.bf16.mxu0 %v916_v15  ;;  %v36_v30 = vld [vmem:[%s1256_s0 + $0x48] sm:$0xff]  ;;  %v37_v31 = vld [vmem:[%s1256_s0 + $0x50] sm:$0xff]  ;;  %v38_v32 = vld [vmem:[%s1256_s0 + $0x58] sm:$0xff]  ;;  %p977_p0 = scmp.ne.s32.totalorder %s655_s12, %s976_s13  ;;  %p982_p2 = scmp.lt.s32.totalorder %s976_s13, %s976_s13 }
   0xf   :  { %v39_v33 = vld [vmem:[%s1256_s0 + $0x60] sm:$0xff]  ;;  %v40_v34 = vld [vmem:[%s1256_s0 + $0x68] sm:$0xff]  ;;  %v41_v35 = vld [vmem:[%s1256_s0 + $0x70] sm:$0xff]  ;;  %v54_v42 = vsub.s32 0, %v1156_v41 }
  0x10   :  { %927 = vmatpush3.bf16.msra.mxu1 %v924_v18  ;;  %v42_v36 = vld [vmem:[%s1256_s0 + $0x78] sm:$0xff]  ;;  %v272_v37 = vld [vmem:[%s1259_s3 + $0x30] sm:$0xff]  ;;  %v1162_v43 = vld [vmem:[%s1258_s2] sm:$0x3]  ;;  %p983_p3 = por %p982_p2, %p981_p1 }
  0x11   :  { %919 = vmatpush3.bf16.msra.mxu0 %v916_v15  ;;  %929 = vmatprep.subr.bf16.mxu1 %v928_v21  ;;  %v273_v38 = vld [vmem:[%s1259_s3 + $0x38] sm:$0xff]  ;;  %v55_v44 = vrot.slane %v1162_v43, %v54_v42  ;;  %v564_v40 = vld [vmem:[%s1261_s5 + $0x30] sm:$0xff] }
  0x12   :  { %v932_v39 = vpack.c.bf16 %v273_v38, %v272_v37  ;;  %v562_v37 = vld [vmem:[%s1261_s5 + $0x20] sm:$0xff]  ;;  %v563_v38 = vld [vmem:[%s1261_s5 + $0x28] sm:$0xff]  ;;  %v565_v42 = vld [vmem:[%s1261_s5 + $0x38] sm:$0xff]  ;;  %p984_p4 = pnand %p983_p3, %p977_p0 }
  0x14   :  { %787 = vmatmul.mubr.msk.f32.vlgmr.msra.gmra.mrb[0].mxu0 %vm56_vm0, %v28_v22  ;;  %931 = vmatpush3.bf16.msra.mxu1 %v928_v21 }
  0x15   :  { %789 = vmatprep.mubr.msk.f32.mxu0 %vm56_vm0, %v29_v23  ;;  %933 = vmatprep.subr.bf16.mxu1 %v932_v39 }
  0x18   :  { %790 = vmatmul.mubr.msk.f32.gmra.mrb[2].mxu0 %vm56_vm0, %v30_v24  ;;  %935 = vmatpush3.bf16.msra.mxu1 %v932_v39  ;;  %v967_v39 = vpack.c.bf16 %v563_v38, %v562_v37  ;;  %v487_v38 = vld [vmem:[%s1260_s4] sm:$0x3] }
  0x19   :  { %792 = vmatprep.mubr.msk.f32.mxu0 %vm56_vm0, %v31_v25 }
  0x1c   :  { %793 = vmatmul.mubr.msk.f32.gmra.mrb[4].mxu0 %vm56_vm0, %v32_v26 }
  0x1d   :  { %795 = vmatprep.mubr.msk.f32.mxu0 %vm56_vm0, %v33_v27 }
  0x20   :  { %796 = vmatmul.mubr.msk.f32.gmra.mrb[6].mxu0 %vm56_vm0, %v34_v28 }
  0x21   :  { %798 = vmatprep.mubr.msk.f32.mxu0 %vm56_vm0, %v35_v29  ;;  %v1000_v29 = vmov 0.0|0.0  }
  0x22   :  { %936 = vmatprep.subr.bf16.mxu0 %v1000_v29  ;;  %960 = vmatprep.subr.bf16.mxu1 %v1000_v29 }
  0x24   :  { %799 = vmatmul.mubr.msk.f32.gmra.mrb[8].mxu0 %vm56_vm0, %v36_v30  ;;  %v1002_v30 = vmov 0.0  }
  0x25   :  { %801 = vmatprep.mubr.msk.f32.mxu0 %vm56_vm0, %v37_v31  ;;  %v558_v31 = vld [vmem:[%s1261_s5] sm:$0xff] }
  0x28   :  { %802 = vmatmul.mubr.msk.f32.gmra.mrb[10].mxu0 %vm56_vm0, %v38_v32  ;;  %v559_v32 = vld [vmem:[%s1261_s5 + $0x8] sm:$0xff] }
  0x29   :  { %804 = vmatprep.mubr.msk.f32.mxu0 %vm56_vm0, %v39_v33  ;;  %v560_v33 = vld [vmem:[%s1261_s5 + $0x10] sm:$0xff] }
  0x2c   :  { %805 = vmatmul.mubr.msk.f32.gmra.mrb[12].mxu0 %vm56_vm0, %v40_v34  ;;  %v961_v34 = vpack.c.bf16 %v559_v32, %v558_v31 }
  0x2d   :  { %807 = vmatprep.mubr.msk.f32.mxu0 %vm56_vm0, %v41_v35  ;;  %v561_v35 = vld [vmem:[%s1261_s5 + $0x18] sm:$0xff] }
  0x30   :  { %808 = vmatmul.mubr.msk.f32.gmra.mrb[14].mxu0 %vm56_vm0, %v42_v36  ;;  %v964_v36 = vpack.c.bf16 %v561_v35, %v560_v33 }
  0x31   :  { %882 = vmatprep.mubr.msk.f32.mxu0 %vm1001_vm1, %v1002_v30 }
  0xe7   :  { %v788_v45 = vpop.f32.mrb[0].mxu0 }
  0xe8   :  { %v177_v46 = vadd.f32 %v788_v45, %v55_v44  ;;  %v171_v47 = vpop.f32.mrb[1].mxu0  ;;  %v276_v45 = vsub.s32 1, %v1156_v41 }
  0xe9   :  { %v172_v48 = vadd.f32 %v171_v47, %v55_v44 }
  0xea   :  { %v251_v51 = vmax.f32 %v177_v46, 0.0  ;;  %v1212_v46 = vrot.slane %v1162_v43, %v276_v45 }
  0xeb   :  { %v250_v49 = vmax.f32 %v172_v48, 0.0  ;;  %v791_v50 = vpop.f32.mrb[2].mxu0 }
  0xec   :  { %v187_v52 = vadd.f32 %v791_v50, %v55_v44  ;;  %v181_v53 = vpop.f32.mrb[3].mxu0 }
  0xed   :  { %v182_v54 = vadd.f32 %v181_v53, %v55_v44  ;;  %826 = vmatprep.mubr.msk.f32.mxu1 %vm56_vm0, %v250_v49 }
  0xee   :  { %827 = vmatmul.mubr.msk.f32.vlgmr.msra.gmra.mrb[0].mxu1 %vm56_vm0, %v251_v51  ;;  %v253_v57 = vmax.f32 %v187_v52, 0.0 }
  0xef   :  { %v252_v55 = vmax.f32 %v182_v54, 0.0  ;;  %v794_v56 = vpop.f32.mrb[4].mxu0  ;;  %962 = vmatpush3.bf16.msra.mxu1 %v961_v34 }
  0xf0   :  { %v197_v58 = vadd.f32 %v794_v56, %v55_v44  ;;  %v191_v59 = vpop.f32.mrb[5].mxu0  ;;  %963 = vmatprep.subr.bf16.mxu1 %v1000_v29 }
  0xf1   :  { %v192_v60 = vadd.f32 %v191_v59, %v55_v44  ;;  %829 = vmatprep.mubr.msk.f32.mxu1 %vm56_vm0, %v252_v55 }
  0xf2   :  { %830 = vmatmul.mubr.msk.f32.gmra.mrb[2].mxu1 %vm56_vm0, %v253_v57  ;;  %v255_v63 = vmax.f32 %v197_v58, 0.0 }
  0xf3   :  { %v254_v61 = vmax.f32 %v192_v60, 0.0  ;;  %v797_v62 = vpop.f32.mrb[6].mxu0  ;;  %965 = vmatpush3.bf16.msra.mxu1 %v964_v36 }
  0xf4   :  { %v207_v0 = vadd.f32 %v797_v62, %v55_v44  ;;  %v201_v1 = vpop.f32.mrb[7].mxu0  ;;  %966 = vmatprep.subr.bf16.mxu1 %v1000_v29 }
  0xf5   :  { %v202_v2 = vadd.f32 %v201_v1, %v55_v44  ;;  %832 = vmatprep.mubr.msk.f32.mxu1 %vm56_vm0, %v254_v61 }
  0xf6   :  { %833 = vmatmul.mubr.msk.f32.gmra.mrb[4].mxu1 %vm56_vm0, %v255_v63  ;;  %v257_v5 = vmax.f32 %v207_v0, 0.0 }
  0xf7   :  { %v256_v3 = vmax.f32 %v202_v2, 0.0  ;;  %v800_v4 = vpop.f32.mrb[8].mxu0  ;;  %968 = vmatpush3.bf16.msra.mxu1 %v967_v39 }
  0xf8   :  { %v217_v6 = vadd.f32 %v800_v4, %v55_v44  ;;  %v211_v7 = vpop.f32.mrb[9].mxu0  ;;  %969 = vmatprep.subr.bf16.mxu1 %v1000_v29 }
  0xf9   :  { %v212_v8 = vadd.f32 %v211_v7, %v55_v44  ;;  %835 = vmatprep.mubr.msk.f32.mxu1 %vm56_vm0, %v256_v3 }
  0xfa   :  { %836 = vmatmul.mubr.msk.f32.gmra.mrb[6].mxu1 %vm56_vm0, %v257_v5  ;;  %v259_v11 = vmax.f32 %v217_v6, 0.0 }
  0xfb   :  { %v258_v9 = vmax.f32 %v212_v8, 0.0  ;;  %v803_v10 = vpop.f32.mrb[10].mxu0 }
  0xfc   :  { %v227_v12 = vadd.f32 %v803_v10, %v55_v44  ;;  %v221_v13 = vpop.f32.mrb[11].mxu0 }
  0xfd   :  { %v222_v14 = vadd.f32 %v221_v13, %v55_v44  ;;  %838 = vmatprep.mubr.msk.f32.mxu1 %vm56_vm0, %v258_v9 }
  0xfe   :  { %839 = vmatmul.mubr.msk.f32.gmra.mrb[8].mxu1 %vm56_vm0, %v259_v11  ;;  %v261_v17 = vmax.f32 %v227_v12, 0.0 }
  0xff   :  { %v260_v15 = vmax.f32 %v222_v14, 0.0  ;;  %v806_v16 = vpop.f32.mrb[12].mxu0 }
 0x100   :  { %v237_v18 = vadd.f32 %v806_v16, %v55_v44  ;;  %v231_v19 = vpop.f32.mrb[13].mxu0 }
 0x101   :  { %v232_v20 = vadd.f32 %v231_v19, %v55_v44  ;;  %841 = vmatprep.mubr.msk.f32.mxu1 %vm56_vm0, %v260_v15 }
 0x102   :  { %842 = vmatmul.mubr.msk.f32.gmra.mrb[10].mxu1 %vm56_vm0, %v261_v17  ;;  %v263_v23 = vmax.f32 %v237_v18, 0.0 }
 0x103   :  { %v262_v21 = vmax.f32 %v232_v20, 0.0  ;;  %v809_v22 = vpop.f32.mrb[14].mxu0 }
 0x104   :  { %v247_v24 = vadd.f32 %v809_v22, %v55_v44  ;;  %v241_v25 = vpop.f32.mrb[15].mxu0 }
 0x105   :  { %v242_v26 = vadd.f32 %v241_v25, %v55_v44  ;;  %844 = vmatprep.mubr.msk.f32.mxu1 %vm56_vm0, %v262_v21  ;;  %v970_v44 = vpack.c.bf16 %v565_v42, %v564_v40  ;;  %v694_v42 = vld [vmem:[%s1262_s6] ss:$0 sm:$0xff] }
 0x106   :  { %845 = vmatmul.mubr.msk.f32.gmra.mrb[12].mxu1 %vm56_vm0, %v263_v23  ;;  %v265_v28 = vmax.f32 %v247_v24, 0.0 }
 0x107   :  { %v264_v27 = vmax.f32 %v242_v26, 0.0  ;;  %971 = vmatpush3.bf16.msra.mxu1 %v970_v44 }
 0x109   :  { %847 = vmatprep.mubr.msk.f32.mxu1 %vm56_vm0, %v264_v27 }
 0x10a   :  { %848 = vmatmul.mubr.msk.f32.gmra.mrb[14].mxu1 %vm56_vm0, %v265_v28 }
 0x10b   :  { %901 = vmatprep.mubr.msk.f32.mxu1 %vm1001_vm1, %v1002_v30 }
 0x1c1   :  { %v828_v47 = vpop.f32.mrb[0].mxu1 }
 0x1c2   :  { %v398_v48 = vadd.f32 %v828_v47, %v1212_v46  ;;  %v392_v49 = vpop.f32.mrb[1].mxu1 }
 0x1c3   :  { %v393_v50 = vadd.f32 %v392_v49, %v1212_v46 }
 0x1c4   :  { %v472_v51 = vmax.f32 %v398_v48, 0.0 }
 0x1c5   :  { %v471_v52 = vmax.f32 %v393_v50, 0.0  ;;  %v831_v53 = vpop.f32.mrb[2].mxu1 }
 0x1c6   :  { %v408_v54 = vadd.f32 %v831_v53, %v1212_v46  ;;  %v402_v55 = vpop.f32.mrb[3].mxu1 }
 0x1c7   :  { %v937_v56 = vpack.c.bf16 %v472_v51, %v471_v52  ;;  %v403_v57 = vadd.f32 %v402_v55, %v1212_v46 }
 0x1c8   :  { %v474_v58 = vmax.f32 %v408_v54, 0.0 }
 0x1c9   :  { %v473_v41 = vmax.f32 %v403_v57, 0.0  ;;  %v834_v59 = vpop.f32.mrb[4].mxu1  ;;  %938 = vmatpush3.bf16.msra.mxu0 %v937_v56 }
 0x1ca   :  { %v418_v43 = vadd.f32 %v834_v59, %v1212_v46  ;;  %v412_v60 = vpop.f32.mrb[5].mxu1  ;;  %939 = vmatprep.subr.bf16.mxu0 %v1000_v29 }
 0x1cb   :  { %v940_v61 = vpack.c.bf16 %v474_v58, %v473_v41  ;;  %v413_v62 = vadd.f32 %v412_v60, %v1212_v46 }
 0x1cc   :  { %v476_v63 = vmax.f32 %v418_v43, 0.0 }
 0x1cd   :  { %v475_v0 = vmax.f32 %v413_v62, 0.0  ;;  %v837_v1 = vpop.f32.mrb[6].mxu1  ;;  %941 = vmatpush3.bf16.msra.mxu0 %v940_v61 }
 0x1ce   :  { %v428_v2 = vadd.f32 %v837_v1, %v1212_v46  ;;  %v422_v3 = vpop.f32.mrb[7].mxu1  ;;  %942 = vmatprep.subr.bf16.mxu0 %v1000_v29 }
 0x1cf   :  { %v943_v4 = vpack.c.bf16 %v476_v63, %v475_v0  ;;  %v423_v5 = vadd.f32 %v422_v3, %v1212_v46 }
 0x1d0   :  { %v478_v6 = vmax.f32 %v428_v2, 0.0 }
 0x1d1   :  { %v477_v7 = vmax.f32 %v423_v5, 0.0  ;;  %v840_v8 = vpop.f32.mrb[8].mxu1  ;;  %944 = vmatpush3.bf16.msra.mxu0 %v943_v4 }
 0x1d2   :  { %v438_v9 = vadd.f32 %v840_v8, %v1212_v46  ;;  %v432_v10 = vpop.f32.mrb[9].mxu1  ;;  %945 = vmatprep.subr.bf16.mxu0 %v1000_v29 }
 0x1d3   :  { %v946_v11 = vpack.c.bf16 %v478_v6, %v477_v7  ;;  %v433_v12 = vadd.f32 %v432_v10, %v1212_v46 }
 0x1d4   :  { %v480_v13 = vmax.f32 %v438_v9, 0.0 }
 0x1d5   :  { %v479_v14 = vmax.f32 %v433_v12, 0.0  ;;  %v843_v15 = vpop.f32.mrb[10].mxu1  ;;  %947 = vmatpush3.bf16.msra.mxu0 %v946_v11 }
 0x1d6   :  { %v448_v16 = vadd.f32 %v843_v15, %v1212_v46  ;;  %v442_v17 = vpop.f32.mrb[11].mxu1  ;;  %948 = vmatprep.subr.bf16.mxu0 %v1000_v29 }
 0x1d7   :  { %v949_v18 = vpack.c.bf16 %v480_v13, %v479_v14  ;;  %v443_v19 = vadd.f32 %v442_v17, %v1212_v46 }
 0x1d8   :  { %v482_v20 = vmax.f32 %v448_v16, 0.0 }
 0x1d9   :  { %v481_v21 = vmax.f32 %v443_v19, 0.0  ;;  %v846_v22 = vpop.f32.mrb[12].mxu1  ;;  %950 = vmatpush3.bf16.msra.mxu0 %v949_v18 }
 0x1da   :  { %v458_v23 = vadd.f32 %v846_v22, %v1212_v46  ;;  %v452_v24 = vpop.f32.mrb[13].mxu1  ;;  %951 = vmatprep.subr.bf16.mxu0 %v1000_v29 }
 0x1db   :  { %v952_v25 = vpack.c.bf16 %v482_v20, %v481_v21  ;;  %v453_v26 = vadd.f32 %v452_v24, %v1212_v46 }
 0x1dc   :  { %v484_v27 = vmax.f32 %v458_v23, 0.0 }
 0x1dd   :  { %v483_v28 = vmax.f32 %v453_v26, 0.0  ;;  %v849_v30 = vpop.f32.mrb[14].mxu1  ;;  %953 = vmatpush3.bf16.msra.mxu0 %v952_v25 }
 0x1de   :  { %v468_v31 = vadd.f32 %v849_v30, %v1212_v46  ;;  %v462_v32 = vpop.f32.mrb[15].mxu1  ;;  %954 = vmatprep.subr.bf16.mxu0 %v1000_v29 }
 0x1df   :  { %v955_v33 = vpack.c.bf16 %v484_v27, %v483_v28  ;;  %v463_v34 = vadd.f32 %v462_v32, %v1212_v46 }
 0x1e0   :  { %v486_v35 = vmax.f32 %v468_v31, 0.0 }
 0x1e1   :  { %v485_v36 = vmax.f32 %v463_v34, 0.0  ;;  %956 = vmatpush3.bf16.msra.mxu0 %v955_v33 }
 0x1e2   :  { %957 = vmatprep.subr.bf16.mxu0 %v1000_v29 }
 0x1e3   :  { %v958_v37 = vpack.c.bf16 %v486_v35, %v485_v36 }
 0x1e5   :  { %959 = vmatpush3.bf16.msra.mxu0 %v958_v37 }
 0x1e8   :  { %883 = vmatmul.mubr.f32.vlgmr.msra.gmra.mrb[16].mxu0 %v487_v38 }
 0x2bb   :  { %v554_v39 = vpop.f32.mrb[16].mxu0 }
 0x2bc   :  { %v884_v40 = vpop.f32.mrb[17].mxu0  ;;  %902 = vmatmul.mubr.msk.f32.vlgmr.msra.gmra.mrb[16].mxu1 %vm56_vm0, %v554_v39 }
 0x38f   :  { %v642_v44 = vpop.f32.mrb[16].mxu1 }
 0x390   :  { %v643_v29 = vadd.f32 %v694_v42, %v642_v44  ;;  %v903_v45 = vpop.f32.mrb[17].mxu1 }
 0x392   :  { %647 = vst.msk [vmem:[#allocation2] sm:$0x3] %vm646_vm2, %v643_v29 }
 0x393   :  { %987 = shalt.err (!%p984_p4)
}
 0x394   :  { %s988_s15 = scalar_lea.hbm %s1263_s7, 32 }
 0x395   :  { %p989_p5 = scmp.ne.s32.totalorder %s1263_s7, %s988_s15  ;;  %p992_p6 = scmp.lt.u32.totalorder %s988_s15, %s1263_s7 }
 0x397   :  { %p994_p7 = pnand %p992_p6, %p989_p5 }
 0x399   :  { %997 = shalt.err (!%p994_p7)
}
 0x39a   :  { %657 = dma.vmem_to_hbm [thread:$0]  %s655_s12, 32, %s1263_s7, [#allocation3]  }
 0x39b   :  { %998 = dma.done.wait [#allocation3], 32  }
 0x39c   :  { %999 = vsyncadd [#allocation3], 4294967264 }
 0x39d   :  { %661 = vsyncpa [#allocation3], 1 }

</bundles_post_ra>
